<compile_context>
chip_gen: v6e
topology: v6e:2x2x1
jax: 0.10.0
libtpu: 0.0.40
codegen_flags: <defaults>
</compile_context>

<pallas_src>
import functools

import jax
import jax.numpy as jnp
from jax.experimental import pallas as pl
from jax.experimental.pallas import tpu as pltpu


# --------------------------------------------------------------------------
# helpers
# --------------------------------------------------------------------------

def _vmem_limit_bytes():
    """Generation-aware VMEM budget (leave headroom for surrounding XLA ops)."""
    try:
        cap = pltpu.get_tpu_info().vmem_capacity_bytes
    except Exception:
        return 48 * 1024 * 1024          # safe on every generation (v7x = 64 MiB)
    return min(int(cap * 3 // 4), 100 * 1024 * 1024)


def _pick_h_tile(H, W, target_rows=512):
    """Row-band height th: a divisor of H whose band (th*W pixel rows) is
    sublane-aligned (th*W % 8 == 0) and at most `target_rows`, preferring
    >= 2 bands per image so the grid pipelines and both v7x cores get work.
    Never falls back to one whole-tensor block."""
    cap = H // 2 if H >= 2 else 1
    best = 0
    for th in range(1, cap + 1):
        if H % th == 0 and th * W <= target_rows and (th * W) % 8 == 0:
            best = th
    if best == 0:
        for th in range(1, H + 1):
            if H % th == 0 and (th * W) % 8 == 0:
                best = th
                break
        else:
            best = 1
    return best


# --------------------------------------------------------------------------
# kernel
# --------------------------------------------------------------------------

def _deconv_bn_relu_kernel(x_ref, w_ref, scale_ref, shift_ref, o_ref, *, apply_relu):
    """One row band of one image.

    x_ref     : (th*W, Cin)        f32, rows = input pixels (channels-last)
    w_ref     : (2, Cin, 2*Cp)     bf16, columns ordered (dj, cout)
    scale_ref : (1, 2*Cp)          f32, folded BN gamma/sqrt(var+eps), tiled over dj
    shift_ref : (1, 2*Cp)          f32, folded conv-bias + BN beta/mean, tiled over dj
    o_ref     : (th, 2, W, 2*Cp)   pixel-shuffled channels-last output band
                                   (row-major identical to (2*th, 2*W, Cp))
    """
    th, _, W, ncol = o_ref.shape
    xb = x_ref[...].astype(jnp.bfloat16)
    scale = scale_ref[...]
    shift = shift_ref[...]
    for di in range(2):                                   # static 2-iteration loop
        y = jnp.dot(xb, w_ref[di], preferred_element_type=jnp.float32)
        y = y * scale + shift                             # fused bias + eval BN
        if apply_relu:
            y = jnp.maximum(y, 0.0)
        # write output rows 2h+di of this band; W is kept as the sublane dim so
        # the reshape is layout-preserving and the store is full-lane (2*Cp).
        o_ref[:, di, :, :] = y.reshape(th, W, ncol).astype(o_ref.dtype)


# --------------------------------------------------------------------------
# wrapper
# --------------------------------------------------------------------------

def decoder_block_pallas(x_nchw, params, *, apply_relu=True,
                         out_dtype=jnp.float32, target_rows=512):
    """Forward pass of DecoderBlock (ConvT(k=2,s=2) + BN(eval) + ReLU), NCHW in/out."""
    w, scale, shift, cout = params['w'], params['scale'], params['shift'], params['cout']
    B, Cin, H, W = x_nchw.shape
    assert w.shape[1] == Cin, (w.shape, Cin)
    ncol = w.shape[2]                    # 2 * Cout_pad (multiple of 128 -> lane dense)
    cp = ncol // 2
    th = _pick_h_tile(H, W, target_rows)
    n_h = H // th
    tm = th * W                          # pixel rows per matmul

    # NCHW -> channels-last pixel rows (single input layout change; the reshape
    # from (B, H, W, Cin) to (B*H*W, Cin) is free).
    x_rows = x_nchw.transpose(0, 2, 3, 1).reshape(B * H * W, Cin)

    out5 = pl.pallas_call(
        functools.partial(_deconv_bn_relu_kernel, apply_relu=apply_relu),
        grid=(B, n_h),
        in_specs=[
            pl.BlockSpec((tm, Cin), lambda b, i: (b * n_h + i, 0)),
            pl.BlockSpec((2, Cin, ncol), lambda b, i: (0, 0, 0)),   # resident weight
            pl.BlockSpec((1, ncol), lambda b, i: (0, 0)),
            pl.BlockSpec((1, ncol), lambda b, i: (0, 0)),
        ],
        out_specs=pl.BlockSpec((None, th, 2, W, ncol),
                               lambda b, i: (b, i, 0, 0, 0)),
        out_shape=jax.ShapeDtypeStruct((B, H, 2, W, ncol), out_dtype),
        compiler_params=pltpu.CompilerParams(
            dimension_semantics=("parallel", "parallel"),
            vmem_limit_bytes=_vmem_limit_bytes()),
    )(x_rows, w, scale, shift)

    # (B, H, 2, W, 2, Cp) row-major == (B, 2H, 2W, Cp): free reshape, then slice
    # away channel padding.  Final transpose only converts to the module's NCHW
    # contract; when chaining decoder stages feed the channels-last tensor
    # directly (and use out_dtype=bf16) instead.
    out_nhwc = out5.reshape(B, 2 * H, 2 * W, cp)[..., :cout]
    return out_nhwc.transpose(0, 3, 1, 2)


# --------------------------------------------------------------------------
# parameter construction (PyTorch layouts -> kernel layouts)
# --------------------------------------------------------------------------

def make_decoder_block_params(key, in_channels, out_channels, *,
                              bn_eps=1e-5, weight_dtype=jnp.bfloat16):
    k_w, k_b, k_g, k_be, k_m, k_v = jax.random.split(key, 6)
    bound = 1.0 / ((in_channels * 4) ** 0.5)
    # torch ConvTranspose2d weight layout: (Cin, Cout, kH, kW) with k = 2
    w = jax.random.uniform(k_w, (in_channels, out_channels, 2, 2), jnp.float32,
                           -bound, bound)
    bias = jax.random.uniform(k_b, (out_channels,), jnp.float32, -bound, bound)
    # eval-mode BatchNorm2d parameters / running statistics
    gamma = jax.random.uniform(k_g, (out_channels,), jnp.float32, 0.5, 1.5)
    beta = jax.random.uniform(k_be, (out_channels,), jnp.float32, -0.5, 0.5)
    run_mean = jax.random.uniform(k_m, (out_channels,), jnp.float32, -0.5, 0.5)
    run_var = jax.random.uniform(k_v, (out_channels,), jnp.float32, 0.5, 1.5)

    bn_scale = gamma / jnp.sqrt(run_var + bn_eps)
    eff_scale = bn_scale                                   # per-cout multiplier
    eff_shift = (bias - run_mean) * bn_scale + beta        # per-cout offset

    # pad Cout so 2*Cout_pad is a multiple of 128 (lane-dense output slab)
    cp = ((out_channels + 63) // 64) * 64
    pad = cp - out_channels
    # (Cin, Cout, di, dj) -> (di, Cin, dj, Cout) -> (2, Cin, 2*Cp): columns (dj, c)
    w_k = jnp.transpose(w, (2, 0, 3, 1))
    w_k = jnp.pad(w_k, ((0, 0), (0, 0), (0, 0), (0, pad)))
    w_k = w_k.reshape(2, in_channels, 2 * cp).astype(weight_dtype)
    scale_k = jnp.tile(jnp.pad(eff_scale, (0, pad), constant_values=1.0), 2)[None, :]
    shift_k = jnp.tile(jnp.pad(eff_shift, (0, pad)), 2)[None, :]

    kernel_params = dict(w=w_k, scale=scale_k, shift=shift_k, cout=out_channels)
    torch_like = dict(w=w, bias=bias, gamma=gamma, beta=beta,
                      running_mean=run_mean, running_var=run_var, eps=bn_eps)
    return kernel_params, torch_like


# --------------------------------------------------------------------------
# pure-JAX reference (eval-mode PyTorch semantics) for the correctness check
# --------------------------------------------------------------------------

def decoder_block_reference(x, tp):
    B, _, H, W = x.shape
    O = tp['w'].shape[1]
    y = jnp.einsum('bchw,coij->bohiwj', x, tp['w'],
                   preferred_element_type=jnp.float32,
                   precision=jax.lax.Precision.HIGHEST)
    y = y.reshape(B, O, 2 * H, 2 * W) + tp['bias'][None, :, None, None]
    y = (y - tp['running_mean'][None, :, None, None]) * \
        (tp['gamma'] / jnp.sqrt(tp['running_var'] + tp['eps']))[None, :, None, None] \
        + tp['beta'][None, :, None, None]
    return jnp.maximum(y, 0.0)


# --------------------------------------------------------------------------
# demo / self-test
# --------------------------------------------------------------------------

if __name__ == "__main__":
    key = jax.random.PRNGKey(0)
    k_p, k_x = jax.random.split(key)

    # small, decoder-representative shapes: DecoderBlock(128 -> 64) on 16x16
    B, Cin, Cout, H, W = 2, 128, 64, 16, 16
    kernel_params, torch_params = make_decoder_block_params(k_p, Cin, Cout)
    x = jax.random.normal(k_x, (B, Cin, H, W), jnp.float32)       # NCHW input

    fwd = jax.jit(lambda xx: decoder_block_pallas(xx, kernel_params))
    out = jax.block_until_ready(fwd(x))

    assert out.shape == (B, Cout, 2 * H, 2 * W), out.shape
    assert bool(jnp.all(jnp.isfinite(out)))

    ref = decoder_block_reference(x, torch_params)
    max_err = float(jnp.max(jnp.abs(out - ref)))
    assert max_err < 5e-2, max_err   # bf16 MXU operands vs f32 reference

    print("KERNEL_OK")
</pallas_src>

<mosaic_0001>
module attributes {stable_mosaic.version = 11 : i64} {
  func.func @_deconv_bn_relu_kernel(%arg0: i32, %arg1: i32, %arg2: memref<128x128xf32, #tpu.memory_space<vmem>>, %arg3: memref<2x128x128xbf16, #tpu.memory_space<vmem>>, %arg4: memref<1x128xf32, #tpu.memory_space<vmem>>, %arg5: memref<1x128xf32, #tpu.memory_space<vmem>>, %arg6: memref<1x8x2x16x128xf32, #tpu.memory_space<vmem>>) attributes {dimension_semantics = [#tpu.dimension_semantics<parallel>, #tpu.dimension_semantics<parallel>], iteration_bounds = array<i64: 2, 2>, scalar_prefetch = 0 : i64, scratch_operands = 0 : i64, tpu.core_type = #tpu.core_type<tc>, window_params = [{transform_indices = @transform_0, window_bounds = array<i64: 128, 128>}, {pipeline_mode = #tpu.pipeline_mode<synchronous>, transform_indices = @transform_1, window_bounds = array<i64: 2, 128, 128>}, {pipeline_mode = #tpu.pipeline_mode<synchronous>, transform_indices = @transform_2, window_bounds = array<i64: 1, 128>}, {pipeline_mode = #tpu.pipeline_mode<synchronous>, transform_indices = @transform_3, window_bounds = array<i64: 1, 128>}, {transform_indices = @transform_4, window_bounds = array<i64: 1, 8, 2, 16, 128>}]} {
    %c0 = arith.constant 0 : index
    %c0_0 = arith.constant 0 : index
    %0 = vector.load %arg2[%c0, %c0_0] : memref<128x128xf32, #tpu.memory_space<vmem>>, vector<128x128xf32>
    %1 = arith.truncf %0 : vector<128x128xf32> to vector<128x128xbf16>
    %c0_1 = arith.constant 0 : index
    %c0_2 = arith.constant 0 : index
    %2 = vector.load %arg4[%c0_1, %c0_2] : memref<1x128xf32, #tpu.memory_space<vmem>>, vector<1x128xf32>
    %c0_3 = arith.constant 0 : index
    %c0_4 = arith.constant 0 : index
    %3 = vector.load %arg5[%c0_3, %c0_4] : memref<1x128xf32, #tpu.memory_space<vmem>>, vector<1x128xf32>
    %c0_5 = arith.constant 0 : index
    %c0_6 = arith.constant 0 : index
    %c0_7 = arith.constant 0 : index
    %4 = vector.load %arg3[%c0_5, %c0_6, %c0_7] : memref<2x128x128xbf16, #tpu.memory_space<vmem>>, vector<1x128x128xbf16>
    %5 = vector.shape_cast %4 : vector<1x128x128xbf16> to vector<128x128xbf16>
    %cst = arith.constant dense<0.000000e+00> : vector<128x128xf32>
    %6 = tpu.matmul %1, %5, %cst {dimension_numbers = #tpu.dot_dimension_numbers<[1], [0], [0], [1], [0, 0, 1, 1], [], []>} : vector<128x128xbf16>, vector<128x128xbf16>, vector<128x128xf32> -> vector<128x128xf32>
    %7 = vector.broadcast %2 : vector<1x128xf32> to vector<128x128xf32>
    %8 = arith.mulf %6, %7 : vector<128x128xf32>
    %9 = vector.broadcast %3 : vector<1x128xf32> to vector<128x128xf32>
    %10 = arith.addf %8, %9 : vector<128x128xf32>
    %cst_8 = arith.constant 0.000000e+00 : f32
    %11 = vector.broadcast %cst_8 : f32 to vector<128x128xf32>
    %12 = arith.maximumf %10, %11 : vector<128x128xf32>
    %13 = vector.shape_cast %12 : vector<128x128xf32> to vector<8x16x128xf32>
    %c0_9 = arith.constant 0 : index
    %c0_10 = arith.constant 0 : index
    %c0_11 = arith.constant 0 : index
    %c0_12 = arith.constant 0 : index
    %c0_13 = arith.constant 0 : index
    %14 = vector.load %arg6[%c0_9, %c0_10, %c0_11, %c0_12, %c0_13] : memref<1x8x2x16x128xf32, #tpu.memory_space<vmem>>, vector<1x8x1x16x128xf32>
    %15 = vector.shape_cast %14 : vector<1x8x1x16x128xf32> to vector<8x16x128xf32>
    %16 = vector.shape_cast %13 : vector<8x16x128xf32> to vector<1x8x1x16x128xf32>
    tpu.vector_store %arg6[%c0_9, %c0_10, %c0_11, %c0_12, %c0_13], %16 {strides = array<i32>} : memref<1x8x2x16x128xf32, #tpu.memory_space<vmem>>, vector<1x8x1x16x128xf32>,
    %c1 = arith.constant 1 : index
    %c0_14 = arith.constant 0 : index
    %c0_15 = arith.constant 0 : index
    %17 = vector.load %arg3[%c1, %c0_14, %c0_15] : memref<2x128x128xbf16, #tpu.memory_space<vmem>>, vector<1x128x128xbf16>
    %18 = vector.shape_cast %17 : vector<1x128x128xbf16> to vector<128x128xbf16>
    %cst_16 = arith.constant dense<0.000000e+00> : vector<128x128xf32>
    %19 = tpu.matmul %1, %18, %cst_16 {dimension_numbers = #tpu.dot_dimension_numbers<[1], [0], [0], [1], [0, 0, 1, 1], [], []>} : vector<128x128xbf16>, vector<128x128xbf16>, vector<128x128xf32> -> vector<128x128xf32>
    %20 = vector.broadcast %2 : vector<1x128xf32> to vector<128x128xf32>
    %21 = arith.mulf %19, %20 : vector<128x128xf32>
    %22 = vector.broadcast %3 : vector<1x128xf32> to vector<128x128xf32>
    %23 = arith.addf %21, %22 : vector<128x128xf32>
    %cst_17 = arith.constant 0.000000e+00 : f32
    %24 = vector.broadcast %cst_17 : f32 to vector<128x128xf32>
    %25 = arith.maximumf %23, %24 : vector<128x128xf32>
    %26 = vector.shape_cast %25 : vector<128x128xf32> to vector<8x16x128xf32>
    %c0_18 = arith.constant 0 : index
    %c0_19 = arith.constant 0 : index
    %c1_20 = arith.constant 1 : index
    %c0_21 = arith.constant 0 : index
    %c0_22 = arith.constant 0 : index
    %27 = vector.load %arg6[%c0_18, %c0_19, %c1_20, %c0_21, %c0_22] : memref<1x8x2x16x128xf32, #tpu.memory_space<vmem>>, vector<1x8x1x16x128xf32>
    %28 = vector.shape_cast %27 : vector<1x8x1x16x128xf32> to vector<8x16x128xf32>
    %29 = vector.shape_cast %26 : vector<8x16x128xf32> to vector<1x8x1x16x128xf32>
    tpu.vector_store %arg6[%c0_18, %c0_19, %c1_20, %c0_21, %c0_22], %29 {strides = array<i32>} : memref<1x8x2x16x128xf32, #tpu.memory_space<vmem>>, vector<1x8x1x16x128xf32>,
    return
  }
  func.func @transform_0(%arg0: i32, %arg1: i32) -> (i32, i32) {
    %c2_i32 = arith.constant 2 : i32
    %0 = arith.muli %arg0, %c2_i32 : i32
    %1 = arith.addi %0, %arg1 : i32
    %c0_i32 = arith.constant 0 : i32
    %c0_i32_0 = arith.constant 0 : i32
    return %1, %c0_i32 : i32, i32
  }
  func.func @transform_1(%arg0: i32, %arg1: i32) -> (i32, i32, i32) {
    %c0_i32 = arith.constant 0 : i32
    %c0_i32_0 = arith.constant 0 : i32
    %c0_i32_1 = arith.constant 0 : i32
    %c0_i32_2 = arith.constant 0 : i32
    return %c0_i32, %c0_i32_0, %c0_i32_1 : i32, i32, i32
  }
  func.func @transform_2(%arg0: i32, %arg1: i32) -> (i32, i32) {
    %c0_i32 = arith.constant 0 : i32
    %c0_i32_0 = arith.constant 0 : i32
    %c0_i32_1 = arith.constant 0 : i32
    return %c0_i32, %c0_i32_0 : i32, i32
  }
  func.func @transform_3(%arg0: i32, %arg1: i32) -> (i32, i32) {
    %c0_i32 = arith.constant 0 : i32
    %c0_i32_0 = arith.constant 0 : i32
    %c0_i32_1 = arith.constant 0 : i32
    return %c0_i32, %c0_i32_0 : i32, i32
  }
  func.func @transform_4(%arg0: i32, %arg1: i32) -> (i32, i32, i32, i32, i32) {
    %c0_i32 = arith.constant 0 : i32
    %c0_i32_0 = arith.constant 0 : i32
    %c0_i32_1 = arith.constant 0 : i32
    %c0_i32_2 = arith.constant 0 : i32
    return %arg0, %arg1, %c0_i32, %c0_i32_0, %c0_i32_1 : i32, i32, i32, i32, i32
  }
}

</mosaic_0001>

<bundles_post_ra>
// kernel: _lambda_.1
= control target key start
LH: loop header
LB: loop body
LE: loop exit
PB: predicated region body
PF: predicated region fallthrough
CT: control target
= control target key end

     0   :  { %s1544_s0 = inlined_call_operand.hbm [shape: f32[512,128], index: 0, kind: input, shape index: {}]   ;;  %s1545_s1 = inlined_call_operand.hbm [shape: bf16[2,128,128], index: 1, kind: input, shape index: {}]   ;;  %s1546_s2 = inlined_call_operand.vmem [shape: f32[1,128], index: 2, kind: input, shape index: {}]   ;;  %s1547_s3 = inlined_call_operand.vmem [shape: f32[1,128], index: 3, kind: input, shape index: {}]   ;;  %s1548_s4 = inlined_call_operand.vmem [shape: f32[2,16,2,16,128], index: 4, kind: output, shape index: {}]  }
   0x1   :  { %1550 = sst [smem:[#allocation9_spill]] %s1545_s1 }
   0x2   :  { %9 = vsyncpa [#allocation3], 0 }
   0x3   :  { %11 = vsyncpa [#allocation3 + $0x1], 0 }
   0x4   :  { %12 = vsyncpa [#allocation5], 0  ;;  %s1281_s15 = smov 0   ;;  %s1283_s16 = smov 0  }
   0x5   :  { %s1285_s17 = smov 0   ;;  %s1287_s18 = smov 0  }
   0x6   :  { %s1289_s19 = smov 0   ;;  %s1291_s20 = smov 0  }
   0x7   :  { %s1293_s21 = smov 0   ;;  %s1295_s22 = smov 0  }
   0x8 LB: > { %s871_s23 = sadd.s32 4294967295, %s1248_s22   ;;  %p54_p0 = scmp.ne.s32.totalorder %s1224_s16, %s1220_s15  ;;  %s1248_s22 = sphi %s1295_s22, %s18_s22   ;;  %s1244_s21 = sphi %s1293_s21, %s1564_s21   ;;  %s1240_s20 = sphi %s1291_s20, %s1563_s20   ;;  %s1236_s19 = sphi %s1289_s19, %s1562_s19   ;;  %s1232_s18 = sphi %s1287_s18, %s1561_s18   ;;  %s1228_s17 = sphi %s1285_s17, %s1560_s17   ;;  %s1224_s16 = sphi %s1283_s16, %s1559_s16   ;;  %s1220_s15 = sphi %s1281_s15, %s1558_s15  }
   0x9   : > { %p1321_p1 = scmp.eq.s32.totalorder %s871_s23, 0  ;;  %p875_p2 = scmp.ge.s32.totalorder %s1248_s22, 1 }
   0xa   : > { %p156_p3 = scmp.lt.s32.totalorder %s1248_s22, 5  ;;  %s1250_s27 = smov [#allocation4]  }
   0xb   : > { %p1329_p4 = por %p1321_p1, %p54_p0  ;;  %s168_s28 = sshll.u32 %s1250_s27, 4  ;;  %s169_s28 = int_to_ptr.vmem [resolvable:$true] %s168_s28 }
   0xc   : > { %p1333_p5 = pnand %p875_p2, %p156_p3  ;;  %s1135_s29 = scalar_lea.vmem %s169_s28, 2048 }
   0xd   : > { %p1136_p9 = scmp.ne.s32.totalorder %s169_s28, %s1135_s29  ;;  %p1143_p12 = scmp.lt.s32.totalorder %s169_s28, %s169_s28 }
   0xe   : > { %p1028_p6 = pneg %p1333_p5  ;;  %p1144_p13 = scmp.lt.s32.totalorder %s1135_s29, %s1135_s29 }
  0x10   : > { %p1029_p7 = pnand %p1028_p6, %p1321_p1  ;;  %p1145_p0 = por %p1144_p13, %p1143_p12 }
  0x12   : > { %p1126_p8 = pneg %p1029_p7 }
  0x14   : > { %p1138_p10 = pnand %p1136_p9, %p1126_p8 }
  0x16   : > { %p1139_p11 = pneg %p1138_p10 }
  0x18   : > { %p1146_p2 = pnand %p1145_p0, %p1139_p11 }
  0x1a   : > { %1149 = shalt.err (!%p1146_p2)
}
  0x1b   : > { %s1251_s30 = smov 64   ;;  %s1252_s5 = smov 4  }
  0x1c   : > { %s1554_s1 = sld [smem:[#allocation9_spill]]  ;;  %s27_s8 = sadd.s32 1, %s1240_s20 }
  0x1d   : > { %p28_p3 = scmp.ge.s32.totalorder %s27_s8, 2  ;;  %s30_s9 = sadd.s32 1, %s1244_s21 }
  0x1e   : > { %s873_s10 = sshll.u32 %s1244_s21, 1  ;;  %s41_s11 = sadd.s32 1, %s1228_s17 }
  0x1f   : > { %s1566_s8 = smov (%p28_p3, %s27_s8), 0  ;;  %s1568_s9 = smov (!%p28_p3, %s30_s9), %s1244_s21 }
  0x20   : > { %s35_s12 = sadd.s32 %s1240_s20, %s873_s10  ;;  %p48_p6 = scmp.ne.s32.totalorder %s1228_s17, %s1224_s16 }
  0x21   : > { %p32_p8 = scmp.ge.s32.totalorder %s1568_s9, 2  ;;  %p49_p9 = scmp.eq.s32.totalorder %s1248_s22, 0 }
  0x22   : > { %1031 = dma.hbm_to_vmem [thread:$0]  (!%p1029_p7), %s1554_s1, 2048, %s169_s28, [#allocation5], %s1251_s30, %s1251_s30, %s1252_s5  }
  0x23   : > { %p1037_p10 = scmp.lt.s32.totalorder %s1248_s22, 4  ;;  %s188_s13 = sand.u32 1, %s1228_s17  }
  0x24   : > { %s1570_s9 = smov (%p32_p8, %s1568_s9), 0  ;;  %p50_p7 = por %p49_p9, %p48_p6 }
  0x25   : > { %1555 = sst [smem:[#allocation8_spill]] %s1570_s9  ;;  %s874_s14 = sshll.u32 %s1570_s9, 1 }
  0x26   : > { %s878_s15 = sshll.u32 %s188_s13, 7  ;;  %s37_s23 = sadd.s32 %s874_s14, %s1566_s8 }
  0x27   : > { %s38_s27 = ssub.s32 %s35_s12, %s37_s23  ;;  %s925_s28 = sshll.u32 %s35_s12, 11 }
  0x28   : > { %p39_p11 = scmp.eq.s32.totalorder %s38_s27, 0  ;;  %s200_s5 = scalar_lea.hbm %s1544_s0, %s925_s28 }
  0x29   : > { %s192_s6 = scalar_lea.vmem [#allocation2], %s878_s15  ;;  %p1366_p12 = pnand %p1037_p10, %p50_p7 }
  0x2a   : > { %s201_s7 = sshll.u32 %s192_s6, 4  ;;  %s189_s9 = scalar_lea.sflag [#allocation3], %s188_s13  ;;  %s202_s7 = int_to_ptr.vmem [resolvable:$true] %s201_s7 }
  0x2b   : > { %s1371_s1 = scalar_select %p39_p11, %s1228_s17, %s41_s11  }
  0x2c   : > { %p1152_p13 = pneg %p1366_p12  ;;  %s1163_s12 = scalar_lea.vmem %s202_s7, 2048 }
  0x2d   : > { %p1164_p0 = scmp.ne.s32.totalorder %s202_s7, %s1163_s12  ;;  %s1253_s14 = smov [#allocation2]  }
  0x2e   : > { %s1168_s23 = sshll.u32 %s1253_s14, 4  ;;  %s1169_s23 = int_to_ptr.vmem [resolvable:$false] %s1168_s23 }
  0x2f   : > { %p1166_p2 = pnand %p1164_p0, %p1152_p13  ;;  %s1170_s15 = scalar_lea.vmem %s1169_s23, 4096 }
  0x30   : > { %p1171_p6 = scmp.lt.s32.totalorder %s202_s7, %s1169_s23  ;;  %p1172_p8 = scmp.lt.s32.totalorder %s1170_s15, %s1163_s12 }
  0x31   : > { %p1167_p3 = pneg %p1166_p2 }
  0x32   : > { %p1173_p9 = por %p1172_p8, %p1171_p6 }
  0x34   : > { %p1174_p10 = pnand %p1173_p9, %p1167_p3 }
  0x36   : > { %1177 = shalt.err (!%p1174_p10)
}
  0x37   : > { %s1254_s27 = smov 128   ;;  %s1255_s11 = smov 8  }
  0x38   : > { %1035 = dma.hbm_to_vmem [thread:$0]  (!%p1366_p12), %s200_s5, 2048, %s202_s7, %s189_s9, %s1254_s27, %s1254_s27, %s1255_s11  }
  0x39   : > { %213 = sbr.rel (%p1333_p5) target bundleno = 329 (0x149), region = 36  ;;  %s215_s13 = sand.u32 (!%p1333_p5), 1, %s1224_s16  }
  0x3a   : > { %s883_s28 = sshll.u32 (!%p1333_p5), %s215_s13, 7  ;;  %s216_s29 = scalar_lea.sflag (!%p1333_p5), [#allocation3], %s215_s13 }
  0x3b   : > { %s1380_s30 = scalar_lea.vmem (!%p1333_p5), [#allocation2], %s883_s28 }
  0x3e   : > { %1211 = dma.done.wait (%p1329_p4), %s216_s29, 2048  }
  0x3f   : > { %1213 = vsyncadd (%p1329_p4), %s216_s29, 4294965248 }
  0x40   : > { %1215 = dma.done.wait (%p1321_p1), [#allocation5], 2048  }
  0x41   : > { %1217 = vsyncadd (%p1321_p1), [#allocation5], 4294965248  ;;  %v1108_v0 = vld [vmem:[#allocation4 + $0x38] sm:$0xff]   ;;  %v1110_v2 = vld [vmem:[#allocation4 + $0x30] sm:$0xff]   ;;  %s885_s24 = sshll.u32 %s1232_s18, 3  ;;  %p257_p1 = scmp.lt.s32.totalorder %s1236_s19, 1 }
  0x42   : > { %v1109_v1 = vld [vmem:[#allocation4 + $0x78] sm:$0xff]   ;;  %958 = vmatprep.subr.bf16.mxu0 %v1108_v0  ;;  %v1111_v3 = vld [vmem:[#allocation4 + $0x70] sm:$0xff]   ;;  %v1112_v4 = vld [vmem:[#allocation4 + $0x28] sm:$0xff]   ;;  %p259_p4 = scmp.lt.s32.totalorder %s885_s24, 15 }
  0x43   : > { %990 = vmatprep.subr.bf16.mxu1 %v1109_v1  ;;  %959 = vmatpush3.bf16.msra.mxu0 %v1108_v0  ;;  %v1113_v5 = vld [vmem:[#allocation4 + $0x68] sm:$0xff]   ;;  %v1114_v6 = vld [vmem:[#allocation4 + $0x20] sm:$0xff]   ;;  %v1116_v8 = vld [vmem:[#allocation4 + $0x18] sm:$0xff]   ;;  %s1572_s19 = smov (!%p257_p1, %s1236_s19), 1 }
  0x44   : > { %991 = vmatpush3.bf16.msra.mxu1 %v1109_v1  ;;  %960 = vmatprep.subr.bf16.mxu0 %v1110_v2  ;;  %v1115_v7 = vld [vmem:[#allocation4 + $0x60] sm:$0xff]   ;;  %v1117_v9 = vld [vmem:[#allocation4 + $0x58] sm:$0xff]   ;;  %v1118_v10 = vld [vmem:[#allocation4 + $0x10] sm:$0xff]   ;;  %s1574_s24 = smov (!%p259_p4, %s885_s24), 15  ;;  %s887_s26 = sshll.u32 %s1572_s19, 6 }
  0x45   : > { %992 = vmatprep.subr.bf16.mxu1 %v1111_v3  ;;  %v268_v11 = vld [vmem:[%s1380_s30] sm:$0xff]  ;;  %v269_v12 = vld [vmem:[%s1380_s30 + $0x8] sm:$0xff]  ;;  %v1119_v13 = vld [vmem:[#allocation4 + $0x50] sm:$0xff]   ;;  %s886_s25 = sshll.u32 %s1574_s24, 2 }
  0x46   : > { %v284_v14 = vpack.c.bf16 %v269_v12, %v268_v11  ;;  %v1120_v15 = vld [vmem:[#allocation4 + $0x8] sm:$0xff]   ;;  %v1122_v17 = vld [vmem:[#allocation4] sm:$0xff]   ;;  %v270_v19 = vld [vmem:[%s1380_s30 + $0x10] sm:$0xff]  ;;  %s263_s9 = sadd.s32 %s887_s26, %s886_s25 }
  0x47   : > { %961 = vmatpush3.bf16.msra.mxu0 %v1110_v2  ;;  %v1121_v16 = vld [vmem:[#allocation4 + $0x48] sm:$0xff]   ;;  %v1123_v18 = vld [vmem:[#allocation4 + $0x40] sm:$0xff]   ;;  %v271_v20 = vld [vmem:[%s1380_s30 + $0x18] sm:$0xff]  ;;  %s888_s12 = sshll.u32 %s263_s9, 3 }
  0x48   : > { %993 = vmatpush3.bf16.msra.mxu1 %v1111_v3  ;;  %962 = vmatprep.subr.bf16.mxu0 %v1112_v4  ;;  %v272_v21 = vld [vmem:[%s1380_s30 + $0x20] sm:$0xff]  ;;  %v273_v22 = vld [vmem:[%s1380_s30 + $0x28] sm:$0xff]  ;;  %v285_v23 = vpack.c.bf16 %v271_v20, %v270_v19  ;;  %v274_v25 = vld [vmem:[%s1380_s30 + $0x30] sm:$0xff]  ;;  %s1426_s14 = scalar_lea.vmem %s1548_s4, %s888_s12 }
  0x49   : > { %994 = vmatprep.subr.bf16.mxu1 %v1113_v5  ;;  %974 = vmatprep.mubr.bf16.mxu0 %v284_v14  ;;  %v286_v24 = vpack.c.bf16 %v273_v22, %v272_v21  ;;  %v275_v26 = vld [vmem:[%s1380_s30 + $0x38] sm:$0xff]  ;;  %v276_v27 = vld [vmem:[%s1380_s30 + $0x40] sm:$0xff]  ;;  %v277_v28 = vld [vmem:[%s1380_s30 + $0x48] sm:$0xff] }
  0x4a   : > { %1006 = vmatprep.mubr.bf16.mxu1 %v284_v14  ;;  %v287_v29 = vpack.c.bf16 %v275_v26, %v274_v25  ;;  %v288_v30 = vpack.c.bf16 %v277_v28, %v276_v27  ;;  %v278_v31 = vld [vmem:[%s1380_s30 + $0x50] sm:$0xff]  ;;  %v279_v32 = vld [vmem:[%s1380_s30 + $0x58] sm:$0xff]  ;;  %v280_v33 = vld [vmem:[%s1380_s30 + $0x60] sm:$0xff] }
  0x4b   : > { %963 = vmatpush3.bf16.msra.mxu0 %v1112_v4  ;;  %v281_v34 = vld [vmem:[%s1380_s30 + $0x68] sm:$0xff]  ;;  %v289_v35 = vpack.c.bf16 %v279_v32, %v278_v31  ;;  %v282_v37 = vld [vmem:[%s1380_s30 + $0x70] sm:$0xff]  ;;  %v283_v38 = vld [vmem:[%s1380_s30 + $0x78] sm:$0xff] }
  0x4c   : > { %995 = vmatpush3.bf16.msra.mxu1 %v1113_v5  ;;  %964 = vmatprep.subr.bf16.mxu0 %v1114_v6  ;;  %v290_v36 = vpack.c.bf16 %v281_v34, %v280_v33  ;;  %v291_v39 = vpack.c.bf16 %v283_v38, %v282_v37  ;;  %v1412_v40 = vld [vmem:[%s1546_s2] ss:$0 sm:$0xff] }
  0x4d   : > { %996 = vmatprep.subr.bf16.mxu1 %v1115_v7  ;;  %v1417_v41 = vld [vmem:[%s1547_s3] ss:$0 sm:$0xff] }
  0x4f   : > { %965 = vmatpush3.bf16.msra.mxu0 %v1114_v6 }
  0x50   : > { %997 = vmatpush3.bf16.msra.mxu1 %v1115_v7  ;;  %966 = vmatprep.subr.bf16.mxu0 %v1116_v8 }
  0x51   : > { %998 = vmatprep.subr.bf16.mxu1 %v1117_v9 }
  0x53   : > { %967 = vmatpush3.bf16.msra.mxu0 %v1116_v8 }
  0x54   : > { %999 = vmatpush3.bf16.msra.mxu1 %v1117_v9  ;;  %968 = vmatprep.subr.bf16.mxu0 %v1118_v10 }
  0x55   : > { %1000 = vmatprep.subr.bf16.mxu1 %v1119_v13 }
  0x57   : > { %969 = vmatpush3.bf16.msra.mxu0 %v1118_v10 }
  0x58   : > { %1001 = vmatpush3.bf16.msra.mxu1 %v1119_v13  ;;  %970 = vmatprep.subr.bf16.mxu0 %v1120_v15 }
  0x59   : > { %1002 = vmatprep.subr.bf16.mxu1 %v1121_v16 }
  0x5b   : > { %971 = vmatpush3.bf16.msra.mxu0 %v1120_v15 }
  0x5c   : > { %1003 = vmatpush3.bf16.msra.mxu1 %v1121_v16  ;;  %972 = vmatprep.subr.bf16.mxu0 %v1122_v17 }
  0x5d   : > { %1004 = vmatprep.subr.bf16.mxu1 %v1123_v18 }
  0x5f   : > { %973 = vmatpush3.bf16.msra.mxu0 %v1122_v17 }
  0x60   : > { %1005 = vmatpush3.bf16.msra.mxu1 %v1123_v18 }
  0x62   : > { %975 = vmatmul.mubr.bf16.vlgmr.msra.gmra.mxu0 %v285_v23 }
  0x63   : > { %1007 = vmatmul.mubr.bf16.vlgmr.msra.gmra.mxu1 %v285_v23  ;;  %978 = vmatprep.mubr.bf16.mxu0 %v286_v24 }
  0x64   : > { %1010 = vmatprep.mubr.bf16.mxu1 %v286_v24 }
  0x6a   : > { %979 = vmatmul.mubr.bf16.gmra.mxu0 %v287_v29 }
  0x6b   : > { %1011 = vmatmul.mubr.bf16.gmra.mxu1 %v287_v29  ;;  %982 = vmatprep.mubr.bf16.mxu0 %v288_v30 }
  0x6c   : > { %1014 = vmatprep.mubr.bf16.mxu1 %v288_v30 }
  0x72   : > { %983 = vmatmul.mubr.bf16.gmra.mxu0 %v289_v35 }
  0x73   : > { %1015 = vmatmul.mubr.bf16.gmra.mxu1 %v289_v35  ;;  %986 = vmatprep.mubr.bf16.mxu0 %v290_v36 }
  0x74   : > { %1018 = vmatprep.mubr.bf16.mxu1 %v290_v36 }
  0x7a   : > { %987 = vmatmul.mubr.bf16.gmra.mxu0 %v291_v39 }
  0x7b   : > { %1019 = vmatmul.mubr.bf16.gmra.mxu1 %v291_v39 }
 0x122   : > { %v976_v42 = vpop.f32.mrf.mxu0 }
 0x123   : > { %v463_v43 = vmul.f32 %v976_v42, %v1412_v40  ;;  %v1008_v44 = vpop.f32.mrf.mxu1 }
 0x124   : > { %v695_v45 = vmul.f32 %v1008_v44, %v1412_v40  ;;  %v392_v46 = vpop.f32.mrf.mxu0 }
 0x125   : > { %v485_v47 = vadd.f32 %v1417_v41, %v463_v43  ;;  %v461_v48 = vmul.f32 %v1412_v40, %v392_v46  ;;  %v630_v49 = vpop.f32.mrf.mxu1 }
 0x126   : > { %v711_v50 = vadd.f32 %v1417_v41, %v695_v45  ;;  %v693_v51 = vmul.f32 %v1412_v40, %v630_v49  ;;  %v977_v52 = vpop.f32.mrf.mxu0 }
 0x127   : > { %v501_v53 = vmax.f32 %v485_v47, 0.0  ;;  %v483_v54 = vadd.f32 %v1417_v41, %v461_v48  ;;  %v464_v55 = vmul.f32 %v977_v52, %v1412_v40  ;;  %v1009_v56 = vpop.f32.mrf.mxu1 }
 0x128   : > { %v727_v57 = vmax.f32 %v711_v50, 0.0  ;;  %v709_v58 = vadd.f32 %v1417_v41, %v693_v51  ;;  %v696_v59 = vmul.f32 %v1009_v56, %v1412_v40  ;;  %v395_v60 = vpop.f32.mrf.mxu0 }
 0x129   : > { %517 = vst [vmem:[%s1426_s14 + $0x20] sm:$0xff] %v501_v53  ;;  %v499_v61 = vmax.f32 %v483_v54, 0.0  ;;  %v486_v62 = vadd.f32 %v1417_v41, %v464_v55  ;;  %v462_v63 = vmul.f32 %v1412_v40, %v395_v60  ;;  %v633_v0 = vpop.f32.mrf.mxu1 }
 0x12a   : > { %909 = vst [vmem:[%s1426_s14 + $0x30] sm:$0xff] %v727_v57  ;;  %v725_v1 = vmax.f32 %v709_v58, 0.0  ;;  %v712_v2 = vadd.f32 %v1417_v41, %v696_v59  ;;  %v694_v3 = vmul.f32 %v1412_v40, %v633_v0  ;;  %v980_v4 = vpop.f32.mrf.mxu0 }
 0x12b   : > { %515 = vst [vmem:[%s1426_s14] sm:$0xff] %v499_v61  ;;  %v502_v5 = vmax.f32 %v486_v62, 0.0  ;;  %v484_v6 = vadd.f32 %v1417_v41, %v462_v63  ;;  %v467_v7 = vmul.f32 %v980_v4, %v1412_v40  ;;  %v1012_v8 = vpop.f32.mrf.mxu1 }
 0x12c   : > { %907 = vst [vmem:[%s1426_s14 + $0x10] sm:$0xff] %v725_v1  ;;  %v728_v9 = vmax.f32 %v712_v2, 0.0  ;;  %v710_v10 = vadd.f32 %v1417_v41, %v694_v3  ;;  %v699_v11 = vmul.f32 %v1012_v8, %v1412_v40  ;;  %v408_v12 = vpop.f32.mrf.mxu0 }
 0x12d   : > { %518 = vst [vmem:[%s1426_s14 + $0x28] sm:$0xff] %v502_v5  ;;  %v500_v13 = vmax.f32 %v484_v6, 0.0  ;;  %v489_v14 = vadd.f32 %v1417_v41, %v467_v7  ;;  %v465_v15 = vmul.f32 %v1412_v40, %v408_v12  ;;  %v646_v16 = vpop.f32.mrf.mxu1 }
 0x12e   : > { %910 = vst [vmem:[%s1426_s14 + $0x38] sm:$0xff] %v728_v9  ;;  %v726_v17 = vmax.f32 %v710_v10, 0.0  ;;  %v715_v18 = vadd.f32 %v1417_v41, %v699_v11  ;;  %v697_v19 = vmul.f32 %v1412_v40, %v646_v16  ;;  %v981_v20 = vpop.f32.mrf.mxu0 }
 0x12f   : > { %516 = vst [vmem:[%s1426_s14 + $0x8] sm:$0xff] %v500_v13  ;;  %v505_v21 = vmax.f32 %v489_v14, 0.0  ;;  %v487_v22 = vadd.f32 %v1417_v41, %v465_v15  ;;  %v468_v23 = vmul.f32 %v981_v20, %v1412_v40  ;;  %v1013_v24 = vpop.f32.mrf.mxu1 }
 0x130   : > { %908 = vst [vmem:[%s1426_s14 + $0x18] sm:$0xff] %v726_v17  ;;  %v731_v25 = vmax.f32 %v715_v18, 0.0  ;;  %v713_v26 = vadd.f32 %v1417_v41, %v697_v19  ;;  %v700_v27 = vmul.f32 %v1013_v24, %v1412_v40  ;;  %v411_v28 = vpop.f32.mrf.mxu0 }
 0x131   : > { %521 = vst [vmem:[%s1426_s14 + $0x60] sm:$0xff] %v505_v21  ;;  %v503_v29 = vmax.f32 %v487_v22, 0.0  ;;  %v490_v30 = vadd.f32 %v1417_v41, %v468_v23  ;;  %v466_v31 = vmul.f32 %v1412_v40, %v411_v28  ;;  %v649_v32 = vpop.f32.mrf.mxu1 }
 0x132   : > { %913 = vst [vmem:[%s1426_s14 + $0x70] sm:$0xff] %v731_v25  ;;  %v729_v33 = vmax.f32 %v713_v26, 0.0  ;;  %v716_v34 = vadd.f32 %v1417_v41, %v700_v27  ;;  %v698_v35 = vmul.f32 %v1412_v40, %v649_v32  ;;  %v984_v36 = vpop.f32.mrf.mxu0 }
 0x133   : > { %519 = vst [vmem:[%s1426_s14 + $0x40] sm:$0xff] %v503_v29  ;;  %v506_v37 = vmax.f32 %v490_v30, 0.0  ;;  %v488_v38 = vadd.f32 %v1417_v41, %v466_v31  ;;  %v471_v39 = vmul.f32 %v984_v36, %v1412_v40  ;;  %v1016_v42 = vpop.f32.mrf.mxu1 }
 0x134   : > { %911 = vst [vmem:[%s1426_s14 + $0x50] sm:$0xff] %v729_v33  ;;  %v732_v43 = vmax.f32 %v716_v34, 0.0  ;;  %v714_v44 = vadd.f32 %v1417_v41, %v698_v35  ;;  %v703_v45 = vmul.f32 %v1016_v42, %v1412_v40  ;;  %v424_v46 = vpop.f32.mrf.mxu0 }
 0x135   : > { %522 = vst [vmem:[%s1426_s14 + $0x68] sm:$0xff] %v506_v37  ;;  %v504_v47 = vmax.f32 %v488_v38, 0.0  ;;  %v493_v48 = vadd.f32 %v1417_v41, %v471_v39  ;;  %v469_v49 = vmul.f32 %v1412_v40, %v424_v46  ;;  %v662_v50 = vpop.f32.mrf.mxu1 }
 0x136   : > { %914 = vst [vmem:[%s1426_s14 + $0x78] sm:$0xff] %v732_v43  ;;  %v730_v51 = vmax.f32 %v714_v44, 0.0  ;;  %v719_v52 = vadd.f32 %v1417_v41, %v703_v45  ;;  %v701_v53 = vmul.f32 %v1412_v40, %v662_v50  ;;  %v985_v54 = vpop.f32.mrf.mxu0 }
 0x137   : > { %520 = vst [vmem:[%s1426_s14 + $0x48] sm:$0xff] %v504_v47  ;;  %v509_v55 = vmax.f32 %v493_v48, 0.0  ;;  %v491_v56 = vadd.f32 %v1417_v41, %v469_v49  ;;  %v472_v57 = vmul.f32 %v985_v54, %v1412_v40  ;;  %v1017_v58 = vpop.f32.mrf.mxu1 }
 0x138   : > { %912 = vst [vmem:[%s1426_s14 + $0x58] sm:$0xff] %v730_v51  ;;  %v735_v59 = vmax.f32 %v719_v52, 0.0  ;;  %v717_v60 = vadd.f32 %v1417_v41, %v701_v53  ;;  %v704_v61 = vmul.f32 %v1017_v58, %v1412_v40  ;;  %v427_v62 = vpop.f32.mrf.mxu0 }
 0x139   : > { %525 = vst [vmem:[%s1426_s14 + $0xa0] sm:$0xff] %v509_v55  ;;  %v507_v63 = vmax.f32 %v491_v56, 0.0  ;;  %v494_v0 = vadd.f32 %v1417_v41, %v472_v57  ;;  %v470_v1 = vmul.f32 %v1412_v40, %v427_v62  ;;  %v665_v2 = vpop.f32.mrf.mxu1 }
 0x13a   : > { %917 = vst [vmem:[%s1426_s14 + $0xb0] sm:$0xff] %v735_v59  ;;  %v733_v3 = vmax.f32 %v717_v60, 0.0  ;;  %v720_v4 = vadd.f32 %v1417_v41, %v704_v61  ;;  %v702_v5 = vmul.f32 %v1412_v40, %v665_v2  ;;  %v988_v6 = vpop.f32.mrf.mxu0 }
 0x13b   : > { %523 = vst [vmem:[%s1426_s14 + $0x80] sm:$0xff] %v507_v63  ;;  %v510_v7 = vmax.f32 %v494_v0, 0.0  ;;  %v492_v8 = vadd.f32 %v1417_v41, %v470_v1  ;;  %v475_v9 = vmul.f32 %v988_v6, %v1412_v40  ;;  %v1020_v10 = vpop.f32.mrf.mxu1 }
 0x13c   : > { %915 = vst [vmem:[%s1426_s14 + $0x90] sm:$0xff] %v733_v3  ;;  %v736_v11 = vmax.f32 %v720_v4, 0.0  ;;  %v718_v12 = vadd.f32 %v1417_v41, %v702_v5  ;;  %v707_v13 = vmul.f32 %v1020_v10, %v1412_v40  ;;  %v440_v14 = vpop.f32.mrf.mxu0 }
 0x13d   : > { %526 = vst [vmem:[%s1426_s14 + $0xa8] sm:$0xff] %v510_v7  ;;  %v508_v15 = vmax.f32 %v492_v8, 0.0  ;;  %v497_v16 = vadd.f32 %v1417_v41, %v475_v9  ;;  %v473_v17 = vmul.f32 %v1412_v40, %v440_v14  ;;  %v678_v18 = vpop.f32.mrf.mxu1 }
 0x13e   : > { %918 = vst [vmem:[%s1426_s14 + $0xb8] sm:$0xff] %v736_v11  ;;  %v734_v19 = vmax.f32 %v718_v12, 0.0  ;;  %v723_v20 = vadd.f32 %v1417_v41, %v707_v13  ;;  %v705_v21 = vmul.f32 %v1412_v40, %v678_v18  ;;  %v989_v22 = vpop.f32.mrf.mxu0 }
 0x13f   : > { %524 = vst [vmem:[%s1426_s14 + $0x88] sm:$0xff] %v508_v15  ;;  %v513_v23 = vmax.f32 %v497_v16, 0.0  ;;  %v495_v24 = vadd.f32 %v1417_v41, %v473_v17  ;;  %v476_v25 = vmul.f32 %v989_v22, %v1412_v40  ;;  %v1021_v26 = vpop.f32.mrf.mxu1 }
 0x140   : > { %916 = vst [vmem:[%s1426_s14 + $0x98] sm:$0xff] %v734_v19  ;;  %v739_v27 = vmax.f32 %v723_v20, 0.0  ;;  %v721_v28 = vadd.f32 %v1417_v41, %v705_v21  ;;  %v708_v29 = vmul.f32 %v1021_v26, %v1412_v40  ;;  %v443_v30 = vpop.f32.mrf.mxu0 }
 0x141   : > { %529 = vst [vmem:[%s1426_s14 + $0xe0] sm:$0xff] %v513_v23  ;;  %v511_v31 = vmax.f32 %v495_v24, 0.0  ;;  %v498_v32 = vadd.f32 %v1417_v41, %v476_v25  ;;  %v474_v33 = vmul.f32 %v1412_v40, %v443_v30  ;;  %v681_v34 = vpop.f32.mrf.mxu1 }
 0x142   : > { %921 = vst [vmem:[%s1426_s14 + $0xf0] sm:$0xff] %v739_v27  ;;  %v737_v35 = vmax.f32 %v721_v28, 0.0  ;;  %v724_v36 = vadd.f32 %v1417_v41, %v708_v29  ;;  %v706_v37 = vmul.f32 %v1412_v40, %v681_v34 }
 0x143   : > { %527 = vst [vmem:[%s1426_s14 + $0xc0] sm:$0xff] %v511_v31  ;;  %v514_v38 = vmax.f32 %v498_v32, 0.0  ;;  %v496_v39 = vadd.f32 %v1417_v41, %v474_v33 }
 0x144   : > { %919 = vst [vmem:[%s1426_s14 + $0xd0] sm:$0xff] %v737_v35  ;;  %v740_v42 = vmax.f32 %v724_v36, 0.0  ;;  %v722_v43 = vadd.f32 %v1417_v41, %v706_v37 }
 0x145   : > { %530 = vst [vmem:[%s1426_s14 + $0xe8] sm:$0xff] %v514_v38  ;;  %v512_v44 = vmax.f32 %v496_v39, 0.0 }
 0x146   : > { %922 = vst [vmem:[%s1426_s14 + $0xf8] sm:$0xff] %v740_v42  ;;  %v738_v45 = vmax.f32 %v722_v43, 0.0 }
 0x147   : > { %528 = vst [vmem:[%s1426_s14 + $0xc8] sm:$0xff] %v512_v44 }
 0x148   : > { %920 = vst [vmem:[%s1426_s14 + $0xd8] sm:$0xff] %v738_v45 }
 0x149 PF: > { %s18_s22 = sadd.s32 1, %s1248_s22   ;;  %s1557_s23 = sld [smem:[#allocation8_spill]] }
 0x14a   : > { %p15_p5 = scmp.ge.s32.totalorder %s18_s22, 6   ;;  %s1558_s15 = smov %s1224_s16 }
 0x14b   : > { %s1559_s16 = smov %s1228_s17  ;;  %s1560_s17 = smov %s1371_s1 }
 0x14c   : > { %s1561_s18 = smov %s1240_s20  ;;  %s1562_s19 = smov %s1244_s21 }
 0x14d   : > { %s1563_s20 = smov %s1566_s8  ;;  %17 = sbr.rel (!%p15_p5) target bundleno = 8 (0x8), region = 82 }
 0x14f   : > { %s1564_s21 = smov %s1557_s23 }
 0x152   :  { %790 = vsyncpa [#allocation3], 1 }
 0x153   :  { %792 = vsyncpa [#allocation3 + $0x1], 1 }
 0x154   :  { %793 = vsyncpa [#allocation5], 1 }

</bundles_post_ra>
